<compile_context>
chip_gen: v5e
topology: v5e:2x2
jax: 0.10.0
libtpu: 0.0.40
codegen_flags: <defaults>
</compile_context>

<pallas_src>
import functools

import jax
import jax.numpy as jnp
from jax.experimental import pallas as pl
from jax.experimental.pallas import tpu as pltpu


def _round_up(x, m):
    return ((x + m - 1) // m) * m


def _pick_tile(n, pref, *, min_tiles=1):
    """Largest multiple of 128 <= pref that divides n, preferring >= min_tiles
    tiles along the axis (n is always a multiple of 128 here)."""
    t = min(pref, n)
    t = (t // 128) * 128
    while t > 128 and (n % t != 0 or n // t < min_tiles):
        t -= 128
    return max(t, 128) if n >= 128 else n


# ---------------- fused layer kernel (scratch accumulator, optional ReLU) ---
def fused_layer_kernel_acc(a_ref, x_ref, w_ref, b_ref, o_ref, acc_ref, *, relu):
    k = pl.program_id(1)

    @pl.when(k == 0)
    def _():
        acc_ref[...] = jnp.zeros_like(acc_ref)

    # projection of this K-slab of X (W resident), then aggregation with A.
    xw = jnp.dot(x_ref[...], w_ref[...], preferred_element_type=jnp.float32)
    acc_ref[...] += jnp.dot(
        a_ref[...], xw.astype(jnp.bfloat16), preferred_element_type=jnp.float32
    )

    @pl.when(k == pl.num_programs(1) - 1)
    def _():
        z = acc_ref[...] + b_ref[...]
        if relu:
            z = jnp.maximum(z, 0.0)
        o_ref[...] = z.astype(o_ref.dtype)


# ------------- fused layer kernel (f32 out, no ReLU, accumulate in o_ref) ---
def fused_layer_kernel_f32out(a_ref, x_ref, w_ref, b_ref, o_ref):
    k = pl.program_id(1)

    @pl.when(k == 0)
    def _():
        # bias init: output block is resident across k (constant index_map).
        o_ref[...] = jnp.broadcast_to(b_ref[...], o_ref.shape)

    xw = jnp.dot(x_ref[...], w_ref[...], preferred_element_type=jnp.float32)
    o_ref[...] += jnp.dot(
        a_ref[...], xw.astype(jnp.bfloat16), preferred_element_type=jnp.float32
    )


def gcn_layer(a_pad, x_pad, w_pad, b_pad, *, tm, tk, relu, out_dtype):
    """O = act(A @ (X @ W) + b), fused projection + aggregation."""
    np_ = a_pad.shape[0]
    fp = x_pad.shape[1]
    hp = w_pad.shape[1]

    in_specs = [
        pl.BlockSpec((tm, tk), lambda i, k: (i, k)),   # A row/col tile (bf16)
        pl.BlockSpec((tk, fp), lambda i, k: (k, 0)),   # X K-slab (bf16)
        pl.BlockSpec((fp, hp), lambda i, k: (0, 0)),   # W resident (bf16)
        pl.BlockSpec((1, hp), lambda i, k: (0, 0)),    # bias resident (f32)
    ]
    out_spec = pl.BlockSpec((tm, hp), lambda i, k: (i, 0))

    if (jnp.dtype(out_dtype) == jnp.dtype(jnp.float32)) and not relu:
        kern = fused_layer_kernel_f32out
        scratch = []
    else:
        kern = functools.partial(fused_layer_kernel_acc, relu=relu)
        scratch = [pltpu.VMEM((tm, hp), jnp.float32)]

    return pl.pallas_call(
        kern,
        out_shape=jax.ShapeDtypeStruct((np_, hp), out_dtype),
        grid_spec=pltpu.PrefetchScalarGridSpec(
            num_scalar_prefetch=0,
            grid=(np_ // tm, np_ // tk),               # reduction axis last
            in_specs=in_specs,
            out_specs=out_spec,
            scratch_shapes=scratch,
        ),
        compiler_params=pltpu.CompilerParams(
            dimension_semantics=("parallel", "arbitrary")
        ),
    )(a_pad, x_pad, w_pad, b_pad)


# ------------------------------- forward -----------------------------------
def gcn_forward(a_hat, x, w1, b1, w2, b2, *, multilabel=False):
    n, f = x.shape
    h = w1.shape[1]
    c = w2.shape[1]

    np_ = _round_up(n, 128)
    fp = _round_up(f, 128)
    hp = _round_up(h, 128)
    cp = _round_up(c, 128)

    # Bigger tiles (mem-bound kernels want >=512-wide tiles), but keep >= 2
    # row tiles where possible so both v7x TensorCores get work.
    tm = _pick_tile(np_, 512, min_tiles=2)
    tk = _pick_tile(np_, 2048)

    def pad2(m, r, cc):
        return jnp.pad(m, ((0, r - m.shape[0]), (0, cc - m.shape[1])))

    a_p = pad2(a_hat, np_, np_).astype(jnp.bfloat16)
    x_p = pad2(x, np_, fp).astype(jnp.bfloat16)
    w1_p = pad2(w1, fp, hp).astype(jnp.bfloat16)
    b1_p = pad2(b1, 1, hp).astype(jnp.float32)
    w2_p = pad2(w2, hp, cp).astype(jnp.bfloat16)
    b2_p = pad2(b2, 1, cp).astype(jnp.float32)

    # ---- GCNConv 1 (fused): hid = relu(A @ (X @ W1) + b1), emitted bf16 ----
    hid_p = gcn_layer(a_p, x_p, w1_p, b1_p, tm=tm, tk=tk,
                      relu=True, out_dtype=jnp.bfloat16)

    # Dropout: module is evaluated with training=False -> identity.
    # TODO(synk): training-mode dropout (pltpu.prng_random_bits mask) not wired.

    # ---- GCNConv 2 (fused): logits = A @ (hid @ W2) + b2, f32 in-place acc --
    logits_p = gcn_layer(a_p, hid_p, w2_p, b2_p, tm=tm, tk=tk,
                         relu=False, out_dtype=jnp.float32)

    hid = hid_p[:n, :h].astype(jnp.float32)   # caller-facing copy back to f32
    logits = logits_p[:n, :c]
    if multilabel:
        out = logits
    else:
        # log_softmax on the tiny [N, C] slice (padded lanes excluded).
        out = jax.nn.log_softmax(logits, axis=1)

    # Match PyTorch module return: ((hid_x, x, x), out)
    return (hid, logits, logits), out


# --------------------------- graph / param glue -----------------------------
def build_normalized_adjacency(edge_index, num_nodes):
    """A_hat = D^-1/2 (A + I) D^-1/2 with PyG GCNConv semantics:
    row i aggregates from source nodes j over edges j -> i (A[dst, src] += 1);
    self-loops added only where missing (add_remaining_self_loops, weight 1)."""
    src, dst = edge_index
    off_diag_w = jnp.where(src == dst, 0.0, 1.0)    # drop existing self-loops
    a = jnp.zeros((num_nodes, num_nodes), jnp.float32)
    a = a.at[dst, src].add(off_diag_w)
    a = a + jnp.eye(num_nodes, dtype=jnp.float32)   # exactly one self-loop/node
    deg = jnp.sum(a, axis=1)
    d_inv_sqrt = jnp.where(deg > 0, 1.0 / jnp.sqrt(deg), 0.0)
    return d_inv_sqrt[:, None] * a * d_inv_sqrt[None, :]


def xavier_uniform(key, shape):
    fan_in, fan_out = shape[0], shape[1]
    limit = (6.0 / (fan_in + fan_out)) ** 0.5
    return jax.random.uniform(key, shape, jnp.float32, -limit, limit)


if __name__ == "__main__":
    N = 16            # number of nodes
    NUM_FEATURES = 8
    HID_DIM = 32
    NUM_CLASSES = 4

    key = jax.random.PRNGKey(0)
    k_x, k_w1, k_w2 = jax.random.split(key, 3)

    x = jax.random.normal(k_x, (N, NUM_FEATURES), jnp.float32)

    # Deterministic edge_index: a ring plus a few extra directed edges.
    src = jnp.concatenate([jnp.arange(N), jnp.array([0, 3, 7, 11])])
    dst = jnp.concatenate([(jnp.arange(N) + 1) % N, jnp.array([8, 12, 2, 5])])
    edge_index = jnp.stack([src, dst]).astype(jnp.int32)

    a_hat = build_normalized_adjacency(edge_index, N)

    w1 = xavier_uniform(k_w1, (NUM_FEATURES, HID_DIM))
    b1 = jnp.zeros((1, HID_DIM), jnp.float32)
    w2 = xavier_uniform(k_w2, (HID_DIM, NUM_CLASSES))
    b2 = jnp.zeros((1, NUM_CLASSES), jnp.float32)

    fwd = jax.jit(gcn_forward)
    (hid_x, logits, _), out = fwd(a_hat, x, w1, b1, w2, b2)
    jax.block_until_ready(out)

    # Reference check in plain f32 JAX (tolerances cover the bf16 data path).
    h_ref = jnp.maximum(a_hat @ (x @ w1) + b1, 0.0)
    z_ref = a_hat @ (h_ref @ w2) + b2
    out_ref = jax.nn.log_softmax(z_ref, axis=1)

    assert hid_x.shape == (N, HID_DIM)
    assert logits.shape == (N, NUM_CLASSES)
    assert out.shape == (N, NUM_CLASSES)
    assert bool(jnp.allclose(hid_x, h_ref, atol=5e-2, rtol=5e-2))
    assert bool(jnp.allclose(logits, z_ref, atol=5e-2, rtol=5e-2))
    assert bool(jnp.allclose(out, out_ref, atol=5e-2, rtol=5e-2))
    assert bool(jnp.allclose(jnp.exp(out).sum(axis=1), 1.0, atol=1e-5))

    print("KERNEL_OK")
</pallas_src>

<mosaic_0001>
module attributes {stable_mosaic.version = 11 : i64} {
  func.func @fused_layer_kernel_acc(%arg0: i32, %arg1: i32, %arg2: memref<128x128xbf16, #tpu.memory_space<vmem>>, %arg3: memref<128x128xbf16, #tpu.memory_space<vmem>>, %arg4: memref<128x128xbf16, #tpu.memory_space<vmem>>, %arg5: memref<1x128xf32, #tpu.memory_space<vmem>>, %arg6: memref<128x128xbf16, #tpu.memory_space<vmem>>, %arg7: memref<128x128xf32, #tpu.memory_space<vmem>>) attributes {dimension_semantics = [#tpu.dimension_semantics<parallel>, #tpu.dimension_semantics<arbitrary>], iteration_bounds = array<i64: 1, 1>, scalar_prefetch = 0 : i64, scratch_operands = 1 : i64, tpu.core_type = #tpu.core_type<tc>, window_params = [{transform_indices = @transform_0, window_bounds = array<i64: 128, 128>}, {transform_indices = @transform_1, window_bounds = array<i64: 128, 128>}, {pipeline_mode = #tpu.pipeline_mode<synchronous>, transform_indices = @transform_2, window_bounds = array<i64: 128, 128>}, {pipeline_mode = #tpu.pipeline_mode<synchronous>, transform_indices = @transform_3, window_bounds = array<i64: 1, 128>}, {transform_indices = @transform_4, window_bounds = array<i64: 128, 128>}]} {
    %c0_i32 = arith.constant 0 : i32
    %0 = arith.cmpi eq, %arg1, %c0_i32 : i32
    %1 = arith.extui %0 : i1 to i32
    %c0_i32_0 = arith.constant 0 : i32
    %2 = arith.cmpi ne, %1, %c0_i32_0 : i32
    scf.if %2 {
      %cst_13 = arith.constant 0.000000e+00 : f32
      %15 = vector.broadcast %cst_13 : f32 to vector<128x128xf32>
      %c0_14 = arith.constant 0 : index
      %c0_15 = arith.constant 0 : index
      %16 = vector.load %arg7[%c0_14, %c0_15] : memref<128x128xf32, #tpu.memory_space<vmem>>, vector<128x128xf32>
      tpu.vector_store %arg7[%c0_14, %c0_15], %15 {strides = array<i32>} : memref<128x128xf32, #tpu.memory_space<vmem>>, vector<128x128xf32>,
    } else {
    }
    %c0 = arith.constant 0 : index
    %c0_1 = arith.constant 0 : index
    %3 = vector.load %arg3[%c0, %c0_1] : memref<128x128xbf16, #tpu.memory_space<vmem>>, vector<128x128xbf16>
    %c0_2 = arith.constant 0 : index
    %c0_3 = arith.constant 0 : index
    %4 = vector.load %arg4[%c0_2, %c0_3] : memref<128x128xbf16, #tpu.memory_space<vmem>>, vector<128x128xbf16>
    %cst = arith.constant dense<0.000000e+00> : vector<128x128xf32>
    %5 = tpu.matmul %3, %4, %cst {dimension_numbers = #tpu.dot_dimension_numbers<[1], [0], [0], [1], [0, 0, 1, 1], [], []>} : vector<128x128xbf16>, vector<128x128xbf16>, vector<128x128xf32> -> vector<128x128xf32>
    %c0_4 = arith.constant 0 : index
    %c0_5 = arith.constant 0 : index
    %6 = vector.load %arg7[%c0_4, %c0_5] : memref<128x128xf32, #tpu.memory_space<vmem>>, vector<128x128xf32>
    %c0_6 = arith.constant 0 : index
    %c0_7 = arith.constant 0 : index
    %7 = vector.load %arg2[%c0_6, %c0_7] : memref<128x128xbf16, #tpu.memory_space<vmem>>, vector<128x128xbf16>
    %8 = arith.truncf %5 : vector<128x128xf32> to vector<128x128xbf16>
    %cst_8 = arith.constant dense<0.000000e+00> : vector<128x128xf32>
    %9 = tpu.matmul %7, %8, %cst_8 {dimension_numbers = #tpu.dot_dimension_numbers<[1], [0], [0], [1], [0, 0, 1, 1], [], []>} : vector<128x128xbf16>, vector<128x128xbf16>, vector<128x128xf32> -> vector<128x128xf32>
    %10 = arith.addf %6, %9 : vector<128x128xf32>
    %c0_9 = arith.constant 0 : index
    %c0_10 = arith.constant 0 : index
    %11 = vector.load %arg7[%c0_9, %c0_10] : memref<128x128xf32, #tpu.memory_space<vmem>>, vector<128x128xf32>
    tpu.vector_store %arg7[%c0_9, %c0_10], %10 {strides = array<i32>} : memref<128x128xf32, #tpu.memory_space<vmem>>, vector<128x128xf32>,
    %c0_i32_11 = arith.constant 0 : i32
    %12 = arith.cmpi eq, %arg1, %c0_i32_11 : i32
    %13 = arith.extui %12 : i1 to i32
    %c0_i32_12 = arith.constant 0 : i32
    %14 = arith.cmpi ne, %13, %c0_i32_12 : i32
    scf.if %14 {
      %c0_13 = arith.constant 0 : index
      %c0_14 = arith.constant 0 : index
      %15 = vector.load %arg7[%c0_13, %c0_14] : memref<128x128xf32, #tpu.memory_space<vmem>>, vector<128x128xf32>
      %c0_15 = arith.constant 0 : index
      %c0_16 = arith.constant 0 : index
      %16 = vector.load %arg5[%c0_15, %c0_16] : memref<1x128xf32, #tpu.memory_space<vmem>>, vector<1x128xf32>
      %17 = vector.broadcast %16 : vector<1x128xf32> to vector<128x128xf32>
      %18 = arith.addf %15, %17 : vector<128x128xf32>
      %cst_17 = arith.constant 0.000000e+00 : f32
      %19 = vector.broadcast %cst_17 : f32 to vector<128x128xf32>
      %20 = arith.maximumf %18, %19 : vector<128x128xf32>
      %21 = arith.truncf %20 : vector<128x128xf32> to vector<128x128xbf16>
      %c0_18 = arith.constant 0 : index
      %c0_19 = arith.constant 0 : index
      %22 = vector.load %arg6[%c0_18, %c0_19] : memref<128x128xbf16, #tpu.memory_space<vmem>>, vector<128x128xbf16>
      tpu.vector_store %arg6[%c0_18, %c0_19], %21 {strides = array<i32>} : memref<128x128xbf16, #tpu.memory_space<vmem>>, vector<128x128xbf16>,
    } else {
    }
    return
  }
  func.func @transform_0(%arg0: i32, %arg1: i32) -> (i32, i32) {
    %c0_i32 = arith.constant 0 : i32
    return %arg0, %arg1 : i32, i32
  }
  func.func @transform_1(%arg0: i32, %arg1: i32) -> (i32, i32) {
    %c0_i32 = arith.constant 0 : i32
    %c0_i32_0 = arith.constant 0 : i32
    return %arg1, %c0_i32 : i32, i32
  }
  func.func @transform_2(%arg0: i32, %arg1: i32) -> (i32, i32) {
    %c0_i32 = arith.constant 0 : i32
    %c0_i32_0 = arith.constant 0 : i32
    %c0_i32_1 = arith.constant 0 : i32
    return %c0_i32, %c0_i32_0 : i32, i32
  }
  func.func @transform_3(%arg0: i32, %arg1: i32) -> (i32, i32) {
    %c0_i32 = arith.constant 0 : i32
    %c0_i32_0 = arith.constant 0 : i32
    %c0_i32_1 = arith.constant 0 : i32
    return %c0_i32, %c0_i32_0 : i32, i32
  }
  func.func @transform_4(%arg0: i32, %arg1: i32) -> (i32, i32) {
    %c0_i32 = arith.constant 0 : i32
    %c0_i32_0 = arith.constant 0 : i32
    return %arg0, %c0_i32 : i32, i32
  }
}

module attributes {stable_mosaic.version = 11 : i64} {
  func.func @fused_layer_kernel_f32out(%arg0: i32, %arg1: i32, %arg2: memref<128x128xbf16, #tpu.memory_space<vmem>>, %arg3: memref<128x128xbf16, #tpu.memory_space<vmem>>, %arg4: memref<128x128xbf16, #tpu.memory_space<vmem>>, %arg5: memref<1x128xf32, #tpu.memory_space<vmem>>, %arg6: memref<128x128xf32, #tpu.memory_space<vmem>>) attributes {dimension_semantics = [#tpu.dimension_semantics<parallel>, #tpu.dimension_semantics<arbitrary>], iteration_bounds = array<i64: 1, 1>, scalar_prefetch = 0 : i64, scratch_operands = 0 : i64, tpu.core_type = #tpu.core_type<tc>, window_params = [{transform_indices = @transform_0, window_bounds = array<i64: 128, 128>}, {transform_indices = @transform_1, window_bounds = array<i64: 128, 128>}, {pipeline_mode = #tpu.pipeline_mode<synchronous>, transform_indices = @transform_2, window_bounds = array<i64: 128, 128>}, {pipeline_mode = #tpu.pipeline_mode<synchronous>, transform_indices = @transform_3, window_bounds = array<i64: 1, 128>}, {transform_indices = @transform_4, window_bounds = array<i64: 128, 128>}]} {
    %c0_i32 = arith.constant 0 : i32
    %0 = arith.cmpi eq, %arg1, %c0_i32 : i32
    %1 = arith.extui %0 : i1 to i32
    %c0_i32_0 = arith.constant 0 : i32
    %2 = arith.cmpi ne, %1, %c0_i32_0 : i32
    scf.if %2 {
      %c0_11 = arith.constant 0 : index
      %c0_12 = arith.constant 0 : index
      %12 = vector.load %arg5[%c0_11, %c0_12] : memref<1x128xf32, #tpu.memory_space<vmem>>, vector<1x128xf32>
      %13 = vector.shape_cast %12 : vector<1x128xf32> to vector<1x128xf32>
      %14 = vector.broadcast %13 : vector<1x128xf32> to vector<128x128xf32>
      %c0_13 = arith.constant 0 : index
      %c0_14 = arith.constant 0 : index
      %15 = vector.load %arg6[%c0_13, %c0_14] : memref<128x128xf32, #tpu.memory_space<vmem>>, vector<128x128xf32>
      tpu.vector_store %arg6[%c0_13, %c0_14], %14 {strides = array<i32>} : memref<128x128xf32, #tpu.memory_space<vmem>>, vector<128x128xf32>,
    } else {
    }
    %c0 = arith.constant 0 : index
    %c0_1 = arith.constant 0 : index
    %3 = vector.load %arg3[%c0, %c0_1] : memref<128x128xbf16, #tpu.memory_space<vmem>>, vector<128x128xbf16>
    %c0_2 = arith.constant 0 : index
    %c0_3 = arith.constant 0 : index
    %4 = vector.load %arg4[%c0_2, %c0_3] : memref<128x128xbf16, #tpu.memory_space<vmem>>, vector<128x128xbf16>
    %cst = arith.constant dense<0.000000e+00> : vector<128x128xf32>
    %5 = tpu.matmul %3, %4, %cst {dimension_numbers = #tpu.dot_dimension_numbers<[1], [0], [0], [1], [0, 0, 1, 1], [], []>} : vector<128x128xbf16>, vector<128x128xbf16>, vector<128x128xf32> -> vector<128x128xf32>
    %c0_4 = arith.constant 0 : index
    %c0_5 = arith.constant 0 : index
    %6 = vector.load %arg6[%c0_4, %c0_5] : memref<128x128xf32, #tpu.memory_space<vmem>>, vector<128x128xf32>
    %c0_6 = arith.constant 0 : index
    %c0_7 = arith.constant 0 : index
    %7 = vector.load %arg2[%c0_6, %c0_7] : memref<128x128xbf16, #tpu.memory_space<vmem>>, vector<128x128xbf16>
    %8 = arith.truncf %5 : vector<128x128xf32> to vector<128x128xbf16>
    %cst_8 = arith.constant dense<0.000000e+00> : vector<128x128xf32>
    %9 = tpu.matmul %7, %8, %cst_8 {dimension_numbers = #tpu.dot_dimension_numbers<[1], [0], [0], [1], [0, 0, 1, 1], [], []>} : vector<128x128xbf16>, vector<128x128xbf16>, vector<128x128xf32> -> vector<128x128xf32>
    %10 = arith.addf %6, %9 : vector<128x128xf32>
    %c0_9 = arith.constant 0 : index
    %c0_10 = arith.constant 0 : index
    %11 = vector.load %arg6[%c0_9, %c0_10] : memref<128x128xf32, #tpu.memory_space<vmem>>, vector<128x128xf32>
    tpu.vector_store %arg6[%c0_9, %c0_10], %10 {strides = array<i32>} : memref<128x128xf32, #tpu.memory_space<vmem>>, vector<128x128xf32>,
    return
  }
  func.func @transform_0(%arg0: i32, %arg1: i32) -> (i32, i32) {
    %c0_i32 = arith.constant 0 : i32
    return %arg0, %arg1 : i32, i32
  }
  func.func @transform_1(%arg0: i32, %arg1: i32) -> (i32, i32) {
    %c0_i32 = arith.constant 0 : i32
    %c0_i32_0 = arith.constant 0 : i32
    return %arg1, %c0_i32 : i32, i32
  }
  func.func @transform_2(%arg0: i32, %arg1: i32) -> (i32, i32) {
    %c0_i32 = arith.constant 0 : i32
    %c0_i32_0 = arith.constant 0 : i32
    %c0_i32_1 = arith.constant 0 : i32
    return %c0_i32, %c0_i32_0 : i32, i32
  }
  func.func @transform_3(%arg0: i32, %arg1: i32) -> (i32, i32) {
    %c0_i32 = arith.constant 0 : i32
    %c0_i32_0 = arith.constant 0 : i32
    %c0_i32_1 = arith.constant 0 : i32
    return %c0_i32, %c0_i32_0 : i32, i32
  }
  func.func @transform_4(%arg0: i32, %arg1: i32) -> (i32, i32) {
    %c0_i32 = arith.constant 0 : i32
    %c0_i32_0 = arith.constant 0 : i32
    return %arg0, %c0_i32 : i32, i32
  }
}

</mosaic_0001>

<bundles_post_ra>
// kernel: gcn_forward.2
= control target key start
LH: loop header
LB: loop body
LE: loop exit
PB: predicated region body
PF: predicated region fallthrough
CT: control target
= control target key end

     0   :  { %s782_s2 = inlined_call_operand.vmem [shape: bf16[128,128], index: 2, kind: input, shape index: {}]   ;;  %s783_s1 = inlined_call_operand.vmem [shape: bf16[128,128], index: 1, kind: input, shape index: {}]   ;;  %s784_s3 = inlined_call_operand.vmem [shape: f32[1,128], index: 3, kind: input, shape index: {}]   ;;  %s785_s0 = inlined_call_operand.vmem [shape: bf16[128,128], index: 0, kind: input, shape index: {}]   ;;  %s786_s4 = inlined_call_operand.vmem [shape: bf16[128,128], index: 4, kind: output, shape index: {}]  }
   0x1   :  { %v585_v0 = vld [vmem:[%s782_s2 + $0x38] sm:$0xff]  ;;  %v584_v1 = vld [vmem:[%s782_s2 + $0x30] sm:$0xff]  ;;  %v583_v2 = vld [vmem:[%s782_s2 + $0x28] sm:$0xff] }
   0x2   :  { %641 = vmatpush.bf16.msra.mxu2 %v585_v0  ;;  %165 = vmatpush.bf16.msra.mxu0 %v585_v0  ;;  %v582_v3 = vld [vmem:[%s782_s2 + $0x20] sm:$0xff]  ;;  %v581_v4 = vld [vmem:[%s782_s2 + $0x18] sm:$0xff]  ;;  %v580_v5 = vld [vmem:[%s782_s2 + $0x10] sm:$0xff] }
   0x3   :  { %v579_v6 = vld [vmem:[%s782_s2 + $0x8] sm:$0xff]  ;;  %v578_v7 = vld [vmem:[%s782_s2] sm:$0xff]  ;;  %v576_v12 = vld [vmem:[%s783_s1 + $0x30] sm:$0xff] }
   0x4   :  { %v574_v8 = vld [vmem:[%s783_s1 + $0x20] sm:$0xff]  ;;  %v575_v10 = vld [vmem:[%s783_s1 + $0x28] sm:$0xff]  ;;  %v572_v13 = vld [vmem:[%s783_s1 + $0x10] sm:$0xff] }
   0x5   :  { %v570_v9 = vld [vmem:[%s783_s1] sm:$0xff]  ;;  %v571_v11 = vld [vmem:[%s783_s1 + $0x8] sm:$0xff]  ;;  %v577_v14 = vld [vmem:[%s783_s1 + $0x38] sm:$0xff] }
   0x6   :  { %642 = vmatpush.bf16.msra.mxu2 %v584_v1  ;;  %166 = vmatpush.bf16.msra.mxu0 %v584_v1  ;;  %v573_v15 = vld [vmem:[%s783_s1 + $0x18] sm:$0xff]  ;;  %v586_v40 = vld [vmem:[%s785_s0] sm:$0xff]  ;;  %v587_v42 = vld [vmem:[%s785_s0 + $0x8] sm:$0xff] }
   0x7   :  { %v590_v41 = vld [vmem:[%s785_s0 + $0x20] sm:$0xff]  ;;  %v591_v43 = vld [vmem:[%s785_s0 + $0x28] sm:$0xff]  ;;  %v588_v44 = vld [vmem:[%s785_s0 + $0x10] sm:$0xff] }
   0x8   :  { %v592_v45 = vld [vmem:[%s785_s0 + $0x30] sm:$0xff]  ;;  %v589_v46 = vld [vmem:[%s785_s0 + $0x18] sm:$0xff]  ;;  %v657_v49 = vld [vmem:[%s784_s3] ss:$0 sm:$0xff] }
   0x9   :  { %v593_v47 = vld [vmem:[%s785_s0 + $0x38] sm:$0xff] }
   0xa   :  { %643 = vmatpush.bf16.msra.mxu2 %v583_v2  ;;  %167 = vmatpush.bf16.msra.mxu0 %v583_v2 }
   0xe   :  { %644 = vmatpush.bf16.msra.mxu2 %v582_v3  ;;  %168 = vmatpush.bf16.msra.mxu0 %v582_v3 }
  0x12   :  { %645 = vmatpush.bf16.msra.mxu2 %v581_v4  ;;  %169 = vmatpush.bf16.msra.mxu0 %v581_v4 }
  0x16   :  { %646 = vmatpush.bf16.msra.mxu2 %v580_v5  ;;  %170 = vmatpush.bf16.msra.mxu0 %v580_v5 }
  0x1a   :  { %647 = vmatpush.bf16.msra.mxu2 %v579_v6  ;;  %171 = vmatpush.bf16.msra.mxu0 %v579_v6 }
  0x1e   :  { %648 = vmatpush.bf16.msra.mxu2 %v578_v7  ;;  %172 = vmatpush.bf16.msra.mxu0 %v578_v7 }
  0x21   :  { %193 = vmatmul.bf16.vlgmr.msra.gmra.mxu2 %v574_v8  ;;  %173 = vmatmul.bf16.vlgmr.msra.gmra.mxu0 %v570_v9 }
  0x31   :  { %198 = vmatmul.bf16.gmra.mxu2 %v575_v10  ;;  %178 = vmatmul.bf16.gmra.mxu0 %v571_v11 }
  0x41   :  { %203 = vmatmul.bf16.gmra.mxu2 %v576_v12  ;;  %183 = vmatmul.bf16.gmra.mxu0 %v572_v13 }
  0x51   :  { %208 = vmatmul.bf16.gmra.mxu2 %v577_v14  ;;  %188 = vmatmul.bf16.gmra.mxu0 %v573_v15 }
  0x9e   :  { %v174_v17 = vpop.f32.mrf.mxu0 }
  0xa4   :  { %v194_v16 = vpop.f32.mrf.mxu2 }
  0xa6   :  { %v176_v19 = vpop.f32.mrf.mxu0 }
  0xa7   :  { %v246_v39 = vpack.c.bf16 %v176_v19, %v174_v17 }
  0xac   :  { %v196_v18 = vpop.f32.mrf.mxu2 }
  0xad   :  { %v250_v34 = vpack.c.bf16 %v196_v18, %v194_v16 }
  0xae   :  { %v179_v21 = vpop.f32.mrf.mxu0 }
  0xb4   :  { %v199_v20 = vpop.f32.mrf.mxu2 }
  0xb6   :  { %v181_v23 = vpop.f32.mrf.mxu0 }
  0xb7   :  { %v247_v38 = vpack.c.bf16 %v181_v23, %v179_v21 }
  0xbc   :  { %v201_v22 = vpop.f32.mrf.mxu2 }
  0xbd   :  { %v251_v33 = vpack.c.bf16 %v201_v22, %v199_v20 }
  0xbe   :  { %v184_v25 = vpop.f32.mrf.mxu0 }
  0xc4   :  { %v204_v24 = vpop.f32.mrf.mxu2 }
  0xc6   :  { %v186_v28 = vpop.f32.mrf.mxu0 }
  0xc7   :  { %v248_v37 = vpack.c.bf16 %v186_v28, %v184_v25 }
  0xcc   :  { %v206_v26 = vpop.f32.mrf.mxu2 }
  0xcd   :  { %v252_v32 = vpack.c.bf16 %v206_v26, %v204_v24 }
  0xce   :  { %v189_v31 = vpop.f32.mrf.mxu0 }
  0xd4   :  { %v209_v27 = vpop.f32.mrf.mxu2 }
  0xd6   :  { %v191_v35 = vpop.f32.mrf.mxu0 }
  0xd7   :  { %v249_v36 = vpack.c.bf16 %v191_v35, %v189_v31 }
  0xdc   :  { %v211_v29 = vpop.f32.mrf.mxu2 }
  0xdd   :  { %v253_v30 = vpack.c.bf16 %v211_v29, %v209_v27 }
  0xdf   :  { %302 = vmatpush.bf16.msra.mxu1 %v253_v30  ;;  %649 = vmatpush.bf16.msra.mxu3 %v253_v30 }
  0xe3   :  { %303 = vmatpush.bf16.msra.mxu1 %v252_v32  ;;  %650 = vmatpush.bf16.msra.mxu3 %v252_v32 }
  0xe7   :  { %304 = vmatpush.bf16.msra.mxu1 %v251_v33  ;;  %651 = vmatpush.bf16.msra.mxu3 %v251_v33 }
  0xeb   :  { %305 = vmatpush.bf16.msra.mxu1 %v250_v34  ;;  %652 = vmatpush.bf16.msra.mxu3 %v250_v34 }
  0xef   :  { %306 = vmatpush.bf16.msra.mxu1 %v249_v36  ;;  %653 = vmatpush.bf16.msra.mxu3 %v249_v36 }
  0xf3   :  { %307 = vmatpush.bf16.msra.mxu1 %v248_v37  ;;  %654 = vmatpush.bf16.msra.mxu3 %v248_v37 }
  0xf7   :  { %308 = vmatpush.bf16.msra.mxu1 %v247_v38  ;;  %655 = vmatpush.bf16.msra.mxu3 %v247_v38 }
  0xfb   :  { %309 = vmatpush.bf16.msra.mxu1 %v246_v39  ;;  %656 = vmatpush.bf16.msra.mxu3 %v246_v39 }
  0xfe   :  { %310 = vmatmul.bf16.vlgmr.msra.gmra.mxu1 %v586_v40  ;;  %330 = vmatmul.bf16.vlgmr.msra.gmra.mxu3 %v590_v41 }
 0x10e   :  { %315 = vmatmul.bf16.gmra.mxu1 %v587_v42  ;;  %335 = vmatmul.bf16.gmra.mxu3 %v591_v43 }
 0x11e   :  { %320 = vmatmul.bf16.gmra.mxu1 %v588_v44  ;;  %340 = vmatmul.bf16.gmra.mxu3 %v592_v45 }
 0x12e   :  { %325 = vmatmul.bf16.gmra.mxu1 %v589_v46  ;;  %345 = vmatmul.bf16.gmra.mxu3 %v593_v47 }
 0x17b   :  { %v311_v48 = vpop.f32.mrf.mxu1 }
 0x17c   :  { %v406_v51 = vadd.f32 %v657_v49, %v311_v48 }
 0x17e   :  { %v422_v54 = vmax.f32 %v406_v51, 0.0 }
 0x181   :  { %v331_v50 = vpop.f32.mrf.mxu3 }
 0x182   :  { %v414_v56 = vadd.f32 %v657_v49, %v331_v50 }
 0x183   :  { %v313_v52 = vpop.f32.mrf.mxu1 }
 0x184   :  { %v407_v53 = vadd.f32 %v657_v49, %v313_v52  ;;  %v430_v61 = vmax.f32 %v414_v56, 0.0 }
 0x186   :  { %v423_v55 = vmax.f32 %v407_v53, 0.0 }
 0x188   :  { %v597_v57 = vpack.c.bf16 %v423_v55, %v422_v54 }
 0x189   :  { %v333_v58 = vpop.f32.mrf.mxu3 }
 0x18a   :  { %598 = vst [vmem:[%s786_s4] sm:$0xff] %v597_v57   ;;  %v415_v59 = vadd.f32 %v657_v49, %v333_v58 }
 0x18b   :  { %v316_v60 = vpop.f32.mrf.mxu1 }
 0x18c   :  { %v431_v62 = vmax.f32 %v415_v59, 0.0  ;;  %v408_v1 = vadd.f32 %v657_v49, %v316_v60 }
 0x18e   :  { %v617_v63 = vpack.c.bf16 %v431_v62, %v430_v61  ;;  %v424_v4 = vmax.f32 %v408_v1, 0.0 }
 0x190   :  { %637 = vst [vmem:[%s786_s4 + $0x20] sm:$0xff] %v617_v63  }
 0x191   :  { %v336_v0 = vpop.f32.mrf.mxu3 }
 0x192   :  { %v416_v6 = vadd.f32 %v657_v49, %v336_v0 }
 0x193   :  { %v318_v2 = vpop.f32.mrf.mxu1 }
 0x194   :  { %v409_v3 = vadd.f32 %v657_v49, %v318_v2  ;;  %v432_v11 = vmax.f32 %v416_v6, 0.0 }
 0x196   :  { %v425_v5 = vmax.f32 %v409_v3, 0.0 }
 0x198   :  { %v602_v7 = vpack.c.bf16 %v425_v5, %v424_v4 }
 0x199   :  { %v338_v8 = vpop.f32.mrf.mxu3 }
 0x19a   :  { %634 = vst [vmem:[%s786_s4 + $0x8] sm:$0xff] %v602_v7   ;;  %v417_v9 = vadd.f32 %v657_v49, %v338_v8 }
 0x19b   :  { %v321_v10 = vpop.f32.mrf.mxu1 }
 0x19c   :  { %v433_v12 = vmax.f32 %v417_v9, 0.0  ;;  %v410_v15 = vadd.f32 %v657_v49, %v321_v10 }
 0x19e   :  { %v622_v13 = vpack.c.bf16 %v433_v12, %v432_v11  ;;  %v426_v18 = vmax.f32 %v410_v15, 0.0 }
 0x1a0   :  { %638 = vst [vmem:[%s786_s4 + $0x28] sm:$0xff] %v622_v13  }
 0x1a1   :  { %v341_v14 = vpop.f32.mrf.mxu3 }
 0x1a2   :  { %v418_v20 = vadd.f32 %v657_v49, %v341_v14 }
 0x1a3   :  { %v323_v16 = vpop.f32.mrf.mxu1 }
 0x1a4   :  { %v411_v17 = vadd.f32 %v657_v49, %v323_v16  ;;  %v434_v25 = vmax.f32 %v418_v20, 0.0 }
 0x1a6   :  { %v427_v19 = vmax.f32 %v411_v17, 0.0 }
 0x1a8   :  { %v607_v21 = vpack.c.bf16 %v427_v19, %v426_v18 }
 0x1a9   :  { %v343_v22 = vpop.f32.mrf.mxu3 }
 0x1aa   :  { %635 = vst [vmem:[%s786_s4 + $0x10] sm:$0xff] %v607_v21   ;;  %v419_v23 = vadd.f32 %v657_v49, %v343_v22 }
 0x1ab   :  { %v326_v24 = vpop.f32.mrf.mxu1 }
 0x1ac   :  { %v435_v26 = vmax.f32 %v419_v23, 0.0  ;;  %v412_v29 = vadd.f32 %v657_v49, %v326_v24 }
 0x1ae   :  { %v627_v27 = vpack.c.bf16 %v435_v26, %v434_v25  ;;  %v428_v32 = vmax.f32 %v412_v29, 0.0 }
 0x1b0   :  { %639 = vst [vmem:[%s786_s4 + $0x30] sm:$0xff] %v627_v27  }
 0x1b1   :  { %v346_v28 = vpop.f32.mrf.mxu3 }
 0x1b2   :  { %v420_v34 = vadd.f32 %v657_v49, %v346_v28 }
 0x1b3   :  { %v328_v30 = vpop.f32.mrf.mxu1 }
 0x1b4   :  { %v413_v31 = vadd.f32 %v657_v49, %v328_v30  ;;  %v436_v38 = vmax.f32 %v420_v34, 0.0 }
 0x1b6   :  { %v429_v33 = vmax.f32 %v413_v31, 0.0 }
 0x1b8   :  { %v612_v35 = vpack.c.bf16 %v429_v33, %v428_v32 }
 0x1b9   :  { %v348_v36 = vpop.f32.mrf.mxu3 }
 0x1ba   :  { %636 = vst [vmem:[%s786_s4 + $0x18] sm:$0xff] %v612_v35   ;;  %v421_v37 = vadd.f32 %v657_v49, %v348_v36 }
 0x1bc   :  { %v437_v39 = vmax.f32 %v421_v37, 0.0 }
 0x1be   :  { %v632_v40 = vpack.c.bf16 %v437_v39, %v436_v38 }
 0x1c0   :  { %640 = vst [vmem:[%s786_s4 + $0x38] sm:$0xff] %v632_v40  }

// kernel: gcn_forward.3
= control target key start
LH: loop header
LB: loop body
LE: loop exit
PB: predicated region body
PF: predicated region fallthrough
CT: control target
= control target key end

     0   :  { %s676_s2 = inlined_call_operand.vmem [shape: bf16[128,128], index: 2, kind: input, shape index: {}]   ;;  %s677_s1 = inlined_call_operand.vmem [shape: bf16[128,128], index: 1, kind: input, shape index: {}]   ;;  %s678_s3 = inlined_call_operand.vmem [shape: f32[1,128], index: 3, kind: input, shape index: {}]   ;;  %s679_s0 = inlined_call_operand.vmem [shape: bf16[128,128], index: 0, kind: input, shape index: {}]   ;;  %s680_s4 = inlined_call_operand.vmem [shape: f32[128,128], index: 4, kind: output, shape index: {}]  }
   0x1   :  { %v502_v0 = vld [vmem:[%s676_s2 + $0x38] sm:$0xff]  ;;  %v501_v1 = vld [vmem:[%s676_s2 + $0x30] sm:$0xff]  ;;  %v500_v2 = vld [vmem:[%s676_s2 + $0x28] sm:$0xff] }
   0x2   :  { %511 = vmatpush.bf16.msra.mxu2 %v502_v0  ;;  %169 = vmatpush.bf16.msra.mxu0 %v502_v0  ;;  %v499_v3 = vld [vmem:[%s676_s2 + $0x20] sm:$0xff]  ;;  %v498_v4 = vld [vmem:[%s676_s2 + $0x18] sm:$0xff]  ;;  %v497_v5 = vld [vmem:[%s676_s2 + $0x10] sm:$0xff] }
   0x3   :  { %v496_v6 = vld [vmem:[%s676_s2 + $0x8] sm:$0xff]  ;;  %v495_v7 = vld [vmem:[%s676_s2] sm:$0xff]  ;;  %v493_v12 = vld [vmem:[%s677_s1 + $0x30] sm:$0xff] }
   0x4   :  { %v491_v8 = vld [vmem:[%s677_s1 + $0x20] sm:$0xff]  ;;  %v492_v10 = vld [vmem:[%s677_s1 + $0x28] sm:$0xff]  ;;  %v489_v13 = vld [vmem:[%s677_s1 + $0x10] sm:$0xff] }
   0x5   :  { %v487_v9 = vld [vmem:[%s677_s1] sm:$0xff]  ;;  %v488_v11 = vld [vmem:[%s677_s1 + $0x8] sm:$0xff]  ;;  %v494_v14 = vld [vmem:[%s677_s1 + $0x38] sm:$0xff] }
   0x6   :  { %512 = vmatpush.bf16.msra.mxu2 %v501_v1  ;;  %170 = vmatpush.bf16.msra.mxu0 %v501_v1  ;;  %v490_v15 = vld [vmem:[%s677_s1 + $0x18] sm:$0xff]  ;;  %v503_v40 = vld [vmem:[%s679_s0] sm:$0xff]  ;;  %v504_v42 = vld [vmem:[%s679_s0 + $0x8] sm:$0xff] }
   0x7   :  { %v507_v41 = vld [vmem:[%s679_s0 + $0x20] sm:$0xff]  ;;  %v508_v43 = vld [vmem:[%s679_s0 + $0x28] sm:$0xff]  ;;  %v505_v44 = vld [vmem:[%s679_s0 + $0x10] sm:$0xff] }
   0x8   :  { %v509_v45 = vld [vmem:[%s679_s0 + $0x30] sm:$0xff]  ;;  %v506_v46 = vld [vmem:[%s679_s0 + $0x18] sm:$0xff]  ;;  %v527_v48 = vld [vmem:[%s678_s3] ss:$0 sm:$0xff] }
   0x9   :  { %v510_v47 = vld [vmem:[%s679_s0 + $0x38] sm:$0xff] }
   0xa   :  { %513 = vmatpush.bf16.msra.mxu2 %v500_v2  ;;  %171 = vmatpush.bf16.msra.mxu0 %v500_v2 }
   0xe   :  { %514 = vmatpush.bf16.msra.mxu2 %v499_v3  ;;  %172 = vmatpush.bf16.msra.mxu0 %v499_v3 }
  0x12   :  { %515 = vmatpush.bf16.msra.mxu2 %v498_v4  ;;  %173 = vmatpush.bf16.msra.mxu0 %v498_v4 }
  0x16   :  { %516 = vmatpush.bf16.msra.mxu2 %v497_v5  ;;  %174 = vmatpush.bf16.msra.mxu0 %v497_v5 }
  0x1a   :  { %517 = vmatpush.bf16.msra.mxu2 %v496_v6  ;;  %175 = vmatpush.bf16.msra.mxu0 %v496_v6 }
  0x1e   :  { %518 = vmatpush.bf16.msra.mxu2 %v495_v7  ;;  %176 = vmatpush.bf16.msra.mxu0 %v495_v7 }
  0x21   :  { %197 = vmatmul.bf16.vlgmr.msra.gmra.mxu2 %v491_v8  ;;  %177 = vmatmul.bf16.vlgmr.msra.gmra.mxu0 %v487_v9 }
  0x31   :  { %202 = vmatmul.bf16.gmra.mxu2 %v492_v10  ;;  %182 = vmatmul.bf16.gmra.mxu0 %v488_v11 }
  0x41   :  { %207 = vmatmul.bf16.gmra.mxu2 %v493_v12  ;;  %187 = vmatmul.bf16.gmra.mxu0 %v489_v13 }
  0x51   :  { %212 = vmatmul.bf16.gmra.mxu2 %v494_v14  ;;  %192 = vmatmul.bf16.gmra.mxu0 %v490_v15 }
  0x9e   :  { %v178_v17 = vpop.f32.mrf.mxu0 }
  0xa4   :  { %v198_v16 = vpop.f32.mrf.mxu2 }
  0xa6   :  { %v180_v19 = vpop.f32.mrf.mxu0 }
  0xa7   :  { %v250_v39 = vpack.c.bf16 %v180_v19, %v178_v17 }
  0xac   :  { %v200_v18 = vpop.f32.mrf.mxu2 }
  0xad   :  { %v254_v34 = vpack.c.bf16 %v200_v18, %v198_v16 }
  0xae   :  { %v183_v21 = vpop.f32.mrf.mxu0 }
  0xb4   :  { %v203_v20 = vpop.f32.mrf.mxu2 }
  0xb6   :  { %v185_v23 = vpop.f32.mrf.mxu0 }
  0xb7   :  { %v251_v38 = vpack.c.bf16 %v185_v23, %v183_v21 }
  0xbc   :  { %v205_v22 = vpop.f32.mrf.mxu2 }
  0xbd   :  { %v255_v33 = vpack.c.bf16 %v205_v22, %v203_v20 }
  0xbe   :  { %v188_v25 = vpop.f32.mrf.mxu0 }
  0xc4   :  { %v208_v24 = vpop.f32.mrf.mxu2 }
  0xc6   :  { %v190_v28 = vpop.f32.mrf.mxu0 }
  0xc7   :  { %v252_v37 = vpack.c.bf16 %v190_v28, %v188_v25 }
  0xcc   :  { %v210_v26 = vpop.f32.mrf.mxu2 }
  0xcd   :  { %v256_v32 = vpack.c.bf16 %v210_v26, %v208_v24 }
  0xce   :  { %v193_v31 = vpop.f32.mrf.mxu0 }
  0xd4   :  { %v213_v27 = vpop.f32.mrf.mxu2 }
  0xd6   :  { %v195_v35 = vpop.f32.mrf.mxu0 }
  0xd7   :  { %v253_v36 = vpack.c.bf16 %v195_v35, %v193_v31 }
  0xdc   :  { %v215_v29 = vpop.f32.mrf.mxu2 }
  0xdd   :  { %v257_v30 = vpack.c.bf16 %v215_v29, %v213_v27 }
  0xdf   :  { %306 = vmatpush.bf16.msra.mxu1 %v257_v30  ;;  %519 = vmatpush.bf16.msra.mxu3 %v257_v30 }
  0xe3   :  { %307 = vmatpush.bf16.msra.mxu1 %v256_v32  ;;  %520 = vmatpush.bf16.msra.mxu3 %v256_v32 }
  0xe7   :  { %308 = vmatpush.bf16.msra.mxu1 %v255_v33  ;;  %521 = vmatpush.bf16.msra.mxu3 %v255_v33 }
  0xeb   :  { %309 = vmatpush.bf16.msra.mxu1 %v254_v34  ;;  %522 = vmatpush.bf16.msra.mxu3 %v254_v34 }
  0xef   :  { %310 = vmatpush.bf16.msra.mxu1 %v253_v36  ;;  %523 = vmatpush.bf16.msra.mxu3 %v253_v36 }
  0xf3   :  { %311 = vmatpush.bf16.msra.mxu1 %v252_v37  ;;  %524 = vmatpush.bf16.msra.mxu3 %v252_v37 }
  0xf7   :  { %312 = vmatpush.bf16.msra.mxu1 %v251_v38  ;;  %525 = vmatpush.bf16.msra.mxu3 %v251_v38 }
  0xfb   :  { %313 = vmatpush.bf16.msra.mxu1 %v250_v39  ;;  %526 = vmatpush.bf16.msra.mxu3 %v250_v39 }
  0xfe   :  { %314 = vmatmul.bf16.vlgmr.msra.gmra.mxu1 %v503_v40  ;;  %334 = vmatmul.bf16.vlgmr.msra.gmra.mxu3 %v507_v41 }
 0x10e   :  { %319 = vmatmul.bf16.gmra.mxu1 %v504_v42  ;;  %339 = vmatmul.bf16.gmra.mxu3 %v508_v43 }
 0x11e   :  { %324 = vmatmul.bf16.gmra.mxu1 %v505_v44  ;;  %344 = vmatmul.bf16.gmra.mxu3 %v509_v45 }
 0x12e   :  { %329 = vmatmul.bf16.gmra.mxu1 %v506_v46  ;;  %349 = vmatmul.bf16.gmra.mxu3 %v510_v47 }
 0x17b   :  { %v315_v49 = vpop.f32.mrf.mxu1 }
 0x17c   :  { %v355_v50 = vadd.f32 %v527_v48, %v315_v49 }
 0x17e   :  { %371 = vst [vmem:[%s680_s4] sm:$0xff] %v355_v50 }
 0x181   :  { %v335_v51 = vpop.f32.mrf.mxu3 }
 0x182   :  { %v363_v52 = vadd.f32 %v527_v48, %v335_v51 }
 0x183   :  { %v317_v53 = vpop.f32.mrf.mxu1 }
 0x184   :  { %379 = vst [vmem:[%s680_s4 + $0x40] sm:$0xff] %v363_v52  ;;  %v356_v54 = vadd.f32 %v527_v48, %v317_v53 }
 0x186   :  { %372 = vst [vmem:[%s680_s4 + $0x8] sm:$0xff] %v356_v54 }
 0x189   :  { %v337_v55 = vpop.f32.mrf.mxu3 }
 0x18a   :  { %v364_v56 = vadd.f32 %v527_v48, %v337_v55 }
 0x18b   :  { %v320_v57 = vpop.f32.mrf.mxu1 }
 0x18c   :  { %380 = vst [vmem:[%s680_s4 + $0x48] sm:$0xff] %v364_v56  ;;  %v357_v58 = vadd.f32 %v527_v48, %v320_v57 }
 0x18e   :  { %373 = vst [vmem:[%s680_s4 + $0x10] sm:$0xff] %v357_v58 }
 0x191   :  { %v340_v59 = vpop.f32.mrf.mxu3 }
 0x192   :  { %v365_v60 = vadd.f32 %v527_v48, %v340_v59 }
 0x193   :  { %v322_v61 = vpop.f32.mrf.mxu1 }
 0x194   :  { %381 = vst [vmem:[%s680_s4 + $0x50] sm:$0xff] %v365_v60  ;;  %v358_v62 = vadd.f32 %v527_v48, %v322_v61 }
 0x196   :  { %374 = vst [vmem:[%s680_s4 + $0x18] sm:$0xff] %v358_v62 }
 0x199   :  { %v342_v63 = vpop.f32.mrf.mxu3 }
 0x19a   :  { %v366_v0 = vadd.f32 %v527_v48, %v342_v63 }
 0x19b   :  { %v325_v1 = vpop.f32.mrf.mxu1 }
 0x19c   :  { %382 = vst [vmem:[%s680_s4 + $0x58] sm:$0xff] %v366_v0  ;;  %v359_v2 = vadd.f32 %v527_v48, %v325_v1 }
 0x19e   :  { %375 = vst [vmem:[%s680_s4 + $0x20] sm:$0xff] %v359_v2 }
 0x1a1   :  { %v345_v3 = vpop.f32.mrf.mxu3 }
 0x1a2   :  { %v367_v4 = vadd.f32 %v527_v48, %v345_v3 }
 0x1a3   :  { %v327_v5 = vpop.f32.mrf.mxu1 }
 0x1a4   :  { %383 = vst [vmem:[%s680_s4 + $0x60] sm:$0xff] %v367_v4  ;;  %v360_v6 = vadd.f32 %v527_v48, %v327_v5 }
 0x1a6   :  { %376 = vst [vmem:[%s680_s4 + $0x28] sm:$0xff] %v360_v6 }
 0x1a9   :  { %v347_v7 = vpop.f32.mrf.mxu3 }
 0x1aa   :  { %v368_v8 = vadd.f32 %v527_v48, %v347_v7 }
 0x1ab   :  { %v330_v9 = vpop.f32.mrf.mxu1 }
 0x1ac   :  { %384 = vst [vmem:[%s680_s4 + $0x68] sm:$0xff] %v368_v8  ;;  %v361_v10 = vadd.f32 %v527_v48, %v330_v9 }
 0x1ae   :  { %377 = vst [vmem:[%s680_s4 + $0x30] sm:$0xff] %v361_v10 }
 0x1b1   :  { %v350_v11 = vpop.f32.mrf.mxu3 }
 0x1b2   :  { %v369_v12 = vadd.f32 %v527_v48, %v350_v11 }
 0x1b3   :  { %v332_v13 = vpop.f32.mrf.mxu1 }
 0x1b4   :  { %385 = vst [vmem:[%s680_s4 + $0x70] sm:$0xff] %v369_v12  ;;  %v362_v14 = vadd.f32 %v527_v48, %v332_v13 }
 0x1b6   :  { %378 = vst [vmem:[%s680_s4 + $0x38] sm:$0xff] %v362_v14 }
 0x1b9   :  { %v352_v15 = vpop.f32.mrf.mxu3 }
 0x1ba   :  { %v370_v16 = vadd.f32 %v527_v48, %v352_v15 }
 0x1bc   :  { %386 = vst [vmem:[%s680_s4 + $0x78] sm:$0xff] %v370_v16 }

</bundles_post_ra>
